<compile_context>
chip_gen: v6e
topology: v6e:2x2x1
jax: 0.10.0
libtpu: 0.0.40
codegen_flags: <defaults>
</compile_context>

<pallas_src>
import functools

import jax
import jax.numpy as jnp
from jax import lax
from jax.experimental import pallas as pl
from jax.experimental.pallas import tpu as pltpu

_VMEM_LIMIT = 48 * 1024 * 1024   # explicit scoped-VMEM limit, headroom under v7x 64 MiB
_BN_EPS = 1e-4


def _choose_l_tile(L, target=2048):
    """Largest multiple of 128 that divides L (capped at `target`), else full L."""
    if L % 128 != 0:
        return L
    best = 128
    for m in range(1, L // 128 + 1):
        lt = 128 * m
        if lt > target:
            break
        if L % lt == 0:
            best = lt
    return best


# --------------------------------------------------------------------------
# Pass 1: per-batch node matrix + GCN  ->  rel (S, Nn) per batch
# --------------------------------------------------------------------------
def _rel_kernel(x_ref, ws_ref, bs_ref, wp_ref, bp_ref, w1_ref, w2_ref, bc_ref,
                rel_ref, acc_ref, *, matmul_dtype):
    lt = pl.program_id(1)

    @pl.when(lt == 0)
    def _():
        acc_ref[...] = jnp.zeros_like(acc_ref)

    xm = x_ref[...].astype(matmul_dtype)                                  # (C, Lt)
    xs = (jnp.dot(ws_ref[...], xm, preferred_element_type=jnp.float32)
          + bs_ref[...])                                                  # (S, Lt) f32
    xp = (jnp.dot(wp_ref[...], xm, preferred_element_type=jnp.float32)
          + bp_ref[...])                                                  # (Nn, Lt) f32
    # Node matrix accumulation over this L-tile: (S, Lt) x (Nn, Lt)^T -> (S, Nn)
    acc_ref[...] += lax.dot_general(
        xs.astype(matmul_dtype), xp.astype(matmul_dtype),
        (((1,), (1,)), ((), ())), preferred_element_type=jnp.float32)

    @pl.when(lt == pl.num_programs(1) - 1)
    def _():
        # GCN (tiny, f32):  rel = (w1 @ x_n) @ w2^T + folded_bias
        xn = acc_ref[...]                                                 # (S, Nn)
        h = jnp.dot(w1_ref[...], xn, preferred_element_type=jnp.float32)
        rel_ref[...] = lax.dot_general(
            h, w2_ref[...], (((1,), (1,)), ((), ())),
            preferred_element_type=jnp.float32) + bc_ref[...]


# --------------------------------------------------------------------------
# Shared recompute:  y = conv_extend( rel @ conv_proj(x_tile) )
# --------------------------------------------------------------------------
def _project_back(x, rel, wp_ref, bp_ref, we_ref, matmul_dtype):
    xm = x.astype(matmul_dtype)
    xp = (jnp.dot(wp_ref[...], xm, preferred_element_type=jnp.float32)
          + bp_ref[...])                                                  # (Nn, Lt) f32
    xs2 = jnp.dot(rel.astype(matmul_dtype), xp.astype(matmul_dtype),
                  preferred_element_type=jnp.float32)                     # (S, Lt)
    y = jnp.dot(we_ref[...], xs2.astype(matmul_dtype),
                preferred_element_type=jnp.float32)                       # (C, Lt)
    return y


# --------------------------------------------------------------------------
# Pass 2: per-batch BN sum / sumsq of y (one-pass statistics)
# --------------------------------------------------------------------------
def _stats_kernel(x_ref, rel_ref, wp_ref, bp_ref, we_ref, stats_ref, *, matmul_dtype):
    lt = pl.program_id(1)

    @pl.when(lt == 0)
    def _():
        stats_ref[...] = jnp.zeros_like(stats_ref)

    y = _project_back(x_ref[...], rel_ref[...], wp_ref, bp_ref, we_ref, matmul_dtype)
    s = jnp.sum(y, axis=1, keepdims=True)                                 # (C, 1)
    sq = jnp.sum(y * y, axis=1, keepdims=True)                            # (C, 1)
    stats_ref[...] += jnp.concatenate([s, sq], axis=1)                    # (C, 2)


# --------------------------------------------------------------------------
# Pass 3: recompute y, normalize (folded BN scale/shift) + residual
# --------------------------------------------------------------------------
def _out_kernel(x_ref, rel_ref, wp_ref, bp_ref, we_ref, scale_ref, shift_ref,
                o_ref, *, matmul_dtype):
    x = x_ref[...]                                                        # (C, Lt) f32
    y = _project_back(x, rel_ref[...], wp_ref, bp_ref, we_ref, matmul_dtype)
    o_ref[...] = (x + y * scale_ref[...] + shift_ref[...]).astype(o_ref.dtype)


# --------------------------------------------------------------------------
# Host wrapper
# --------------------------------------------------------------------------
def glore_unit_forward(x_nchw, params, *, l_tile=None, matmul_dtype=jnp.float32):
    N, C, H, W = x_nchw.shape
    L = H * W
    S = params['w_state'].shape[0]
    Nn = params['w_proj'].shape[0]

    if l_tile is None:
        l_tile = _choose_l_tile(L)
    assert L % l_tile == 0 and (l_tile % 128 == 0 or l_tile == L)
    n_lt = L // l_tile

    # Free reshape (no transpose, no HBM pass): (N, C, H, W) -> (N, C, L)
    x = x_nchw.reshape(N, C, L).astype(jnp.float32)

    md = matmul_dtype
    ws = params['w_state'].astype(md)
    wp = params['w_proj'].astype(md)
    we = params['w_extend'].astype(md)
    bs = params['b_state'].astype(jnp.float32)[:, None]
    bp = params['b_proj'].astype(jnp.float32)[:, None]
    w1 = params['w_gcn1'].astype(jnp.float32)
    w2 = params['w_gcn2'].astype(jnp.float32)
    # Fold both GCN conv1d biases (exact: no nonlinearity between the convs).
    bc = (params['b_gcn1'][:, None] * jnp.sum(params['w_gcn2'], axis=1)[None, :]
          + params['b_gcn2'][None, :]).astype(jnp.float32)                # (S, Nn)

    def wspec(shape):
        nd = len(shape)
        return pl.BlockSpec(shape, lambda n, l, _nd=nd: (0,) * _nd)

    xspec = pl.BlockSpec((None, C, l_tile), lambda n, l: (n, 0, l))
    relspec = pl.BlockSpec((None, S, Nn), lambda n, l: (n, 0, 0))

    cp_red = pltpu.CompilerParams(
        dimension_semantics=("parallel", "arbitrary"),
        vmem_limit_bytes=_VMEM_LIMIT)
    cp_par = pltpu.CompilerParams(
        dimension_semantics=("parallel", "parallel"),
        vmem_limit_bytes=_VMEM_LIMIT)

    flops_proj = 2 * N * L * (S * C + Nn * C + S * Nn)
    flops_gcn = 2 * N * (S * S * Nn + S * Nn * Nn)
    flops_back = 2 * N * L * (Nn * C + S * Nn + C * S)
    w_bytes = 4 * (S * C + Nn * C + S + Nn + S * S + Nn * Nn + S * Nn + C * S + 2 * C)
    x_bytes = 4 * N * C * L

    # ---- pass 1: rel (N, S, Nn) ------------------------------------------
    rel = pl.pallas_call(
        functools.partial(_rel_kernel, matmul_dtype=md),
        grid=(N, n_lt),
        in_specs=[xspec, wspec((S, C)), wspec((S, 1)), wspec((Nn, C)),
                  wspec((Nn, 1)), wspec((S, S)), wspec((Nn, Nn)), wspec((S, Nn))],
        out_specs=relspec,
        out_shape=jax.ShapeDtypeStruct((N, S, Nn), jnp.float32),
        scratch_shapes=[pltpu.VMEM((S, Nn), jnp.float32)],
        compiler_params=cp_red,
        cost_estimate=pl.CostEstimate(flops=flops_proj + flops_gcn, transcendentals=0,
                                      bytes_accessed=x_bytes + w_bytes + 4 * N * S * Nn),
    )(x, ws, bs, wp, bp, w1, w2, bc)

    # ---- pass 2: per-batch BN sum / sumsq --------------------------------
    stats = pl.pallas_call(
        functools.partial(_stats_kernel, matmul_dtype=md),
        grid=(N, n_lt),
        in_specs=[xspec, relspec, wspec((Nn, C)), wspec((Nn, 1)), wspec((C, S))],
        out_specs=pl.BlockSpec((None, C, 2), lambda n, l: (n, 0, 0)),
        out_shape=jax.ShapeDtypeStruct((N, C, 2), jnp.float32),
        compiler_params=cp_red,
        cost_estimate=pl.CostEstimate(flops=flops_back + 3 * N * C * L, transcendentals=0,
                                      bytes_accessed=x_bytes + w_bytes + 4 * N * C * 2),
    )(x, rel, wp, bp, we)

    # ---- tiny host-side fold of the BN statistics ------------------------
    count = jnp.float32(N * L)
    tot = jnp.sum(stats, axis=0)                                          # (C, 2)
    mean = tot[:, 0] / count
    var = jnp.maximum(tot[:, 1] / count - mean * mean, 0.0)
    inv = lax.rsqrt(var + _BN_EPS)
    gamma = params['bn_gamma'].astype(jnp.float32)
    beta = params['bn_beta'].astype(jnp.float32)
    scale = (gamma * inv)[:, None]                                        # (C, 1)
    shift = (beta - mean * gamma * inv)[:, None]                          # (C, 1)

    # ---- pass 3: normalize + residual (aliases x's HBM buffer) -----------
    out = pl.pallas_call(
        functools.partial(_out_kernel, matmul_dtype=md),
        grid=(N, n_lt),
        in_specs=[xspec, relspec, wspec((Nn, C)), wspec((Nn, 1)), wspec((C, S)),
                  wspec((C, 1)), wspec((C, 1))],
        out_specs=pl.BlockSpec((None, C, l_tile), lambda n, l: (n, 0, l)),
        out_shape=jax.ShapeDtypeStruct((N, C, L), x.dtype),
        compiler_params=cp_par,
        input_output_aliases={0: 0},
        cost_estimate=pl.CostEstimate(flops=flops_back + 4 * N * C * L, transcendentals=0,
                                      bytes_accessed=2 * x_bytes + w_bytes),
    )(x, rel, wp, bp, we, scale, shift)

    return out.reshape(N, C, H, W)


# --------------------------------------------------------------------------
# Pure-JAX reference of the PyTorch forward (train-mode BN, normalize=False)
# --------------------------------------------------------------------------
def glore_unit_ref(x_nchw, p):
    N, C, H, W = x_nchw.shape
    L = H * W
    x = x_nchw.reshape(N, C, L).astype(jnp.float32)
    xs = jnp.einsum('oc,ncl->nol', p['w_state'], x) + p['b_state'][None, :, None]
    xp = jnp.einsum('oc,ncl->nol', p['w_proj'], x) + p['b_proj'][None, :, None]
    xn = jnp.einsum('nsl,nml->nsm', xs, xp)
    h = jnp.einsum('os,nsm->nom', p['w_gcn1'], xn) + p['b_gcn1'][None, :, None]
    rel = jnp.einsum('nsm,om->nso', h, p['w_gcn2']) + p['b_gcn2'][None, None, :]
    xs2 = jnp.einsum('nsm,nml->nsl', rel, xp)
    y = jnp.einsum('cs,nsl->ncl', p['w_extend'], xs2)
    mean = y.mean(axis=(0, 2), keepdims=True)
    var = ((y - mean) ** 2).mean(axis=(0, 2), keepdims=True)
    bn = (y - mean) / jnp.sqrt(var + _BN_EPS) * p['bn_gamma'][None, :, None] \
        + p['bn_beta'][None, :, None]
    return (x + bn).reshape(N, C, H, W)


if __name__ == "__main__":
    # Module hyper-params: num_in=16, num_mid=4 -> num_s=8, num_n=16 (fixed).
    N, num_in, H, W = 2, 16, 16, 16
    num_mid = 4
    num_s = 2 * num_mid
    num_n = 16

    key = jax.random.PRNGKey(0)
    keys = jax.random.split(key, 10)

    params = {
        'w_state': 0.1 * jax.random.normal(keys[0], (num_s, num_in), jnp.float32),
        'b_state': 0.1 * jax.random.normal(keys[1], (num_s,), jnp.float32),
        'w_proj': 0.1 * jax.random.normal(keys[2], (num_n, num_in), jnp.float32),
        'b_proj': 0.1 * jax.random.normal(keys[3], (num_n,), jnp.float32),
        'w_gcn1': 0.1 * jax.random.normal(keys[4], (num_s, num_s), jnp.float32),
        'b_gcn1': 0.1 * jax.random.normal(keys[5], (num_s,), jnp.float32),
        'w_gcn2': 0.1 * jax.random.normal(keys[6], (num_n, num_n), jnp.float32),
        'b_gcn2': 0.1 * jax.random.normal(keys[7], (num_n,), jnp.float32),
        'w_extend': 0.1 * jax.random.normal(keys[8], (num_in, num_s), jnp.float32),
        'bn_gamma': jnp.ones((num_in,), jnp.float32),
        'bn_beta': jnp.zeros((num_in,), jnp.float32),
    }

    x = jax.random.normal(keys[9], (N, num_in, H, W), jnp.float32)
    ref = glore_unit_ref(x, params)

    # f32 matmul path (exact check); l_tile=128 exercises the L-tiled grid.
    fwd_f32 = jax.jit(functools.partial(glore_unit_forward,
                                        l_tile=128, matmul_dtype=jnp.float32))
    out = jax.block_until_ready(fwd_f32(x, params))
    assert out.shape == (N, num_in, H, W)
    assert jnp.allclose(out, ref, atol=1e-3, rtol=1e-3), "f32 path mismatch vs reference"

    # bf16 matmul-operand path (perf feedback for v6e/v7x MXU); sanity-bounded.
    fwd_bf16 = jax.jit(functools.partial(glore_unit_forward,
                                         l_tile=128, matmul_dtype=jnp.bfloat16))
    out_bf16 = jax.block_until_ready(fwd_bf16(x, params))
    err = float(jnp.max(jnp.abs(out_bf16 - ref)))
    assert err < 0.25, f"bf16 path deviation too large: {err}"

    print("KERNEL_OK")
</pallas_src>

<mosaic_0001>
module attributes {stable_mosaic.version = 11 : i64} {
  func.func @_stats_kernel(%arg0: i32, %arg1: i32, %arg2: memref<1x16x128xf32, #tpu.memory_space<vmem>>, %arg3: memref<1x8x16xf32, #tpu.memory_space<vmem>>, %arg4: memref<16x16xf32, #tpu.memory_space<vmem>>, %arg5: memref<16x1xf32, #tpu.memory_space<vmem>>, %arg6: memref<16x8xf32, #tpu.memory_space<vmem>>, %arg7: memref<1x16x2xf32, #tpu.memory_space<vmem>>) attributes {dimension_semantics = [#tpu.dimension_semantics<parallel>, #tpu.dimension_semantics<arbitrary>], iteration_bounds = array<i64: 2, 2>, scalar_prefetch = 0 : i64, scratch_operands = 0 : i64, tpu.core_type = #tpu.core_type<tc>, window_params = [{transform_indices = @transform_0, window_bounds = array<i64: 1, 16, 128>}, {transform_indices = @transform_1, window_bounds = array<i64: 1, 8, 16>}, {pipeline_mode = #tpu.pipeline_mode<synchronous>, transform_indices = @transform_2, window_bounds = array<i64: 16, 16>}, {pipeline_mode = #tpu.pipeline_mode<synchronous>, transform_indices = @transform_3, window_bounds = array<i64: 16, 1>}, {pipeline_mode = #tpu.pipeline_mode<synchronous>, transform_indices = @transform_4, window_bounds = array<i64: 16, 8>}, {transform_indices = @transform_5, window_bounds = array<i64: 1, 16, 2>}]} {
    %c0_i32 = arith.constant 0 : i32
    %0 = arith.cmpi eq, %arg1, %c0_i32 : i32
    %1 = arith.extui %0 : i1 to i32
    %c0_i32_0 = arith.constant 0 : i32
    %2 = arith.cmpi ne, %1, %c0_i32_0 : i32
    scf.if %2 {
      %cst_22 = arith.constant 0.000000e+00 : f32
      %27 = vector.broadcast %cst_22 : f32 to vector<16x2xf32>
      %c0_23 = arith.constant 0 : index
      %c0_24 = arith.constant 0 : index
      %c0_25 = arith.constant 0 : index
      %28 = vector.load %arg7[%c0_23, %c0_24, %c0_25] : memref<1x16x2xf32, #tpu.memory_space<vmem>>, vector<1x16x2xf32>
      %29 = vector.shape_cast %28 : vector<1x16x2xf32> to vector<16x2xf32>
      %30 = vector.shape_cast %27 : vector<16x2xf32> to vector<1x16x2xf32>
      tpu.vector_store %arg7[%c0_23, %c0_24, %c0_25], %30 {strides = array<i32>} : memref<1x16x2xf32, #tpu.memory_space<vmem>>, vector<1x16x2xf32>,
    } else {
    }
    %c0 = arith.constant 0 : index
    %c0_1 = arith.constant 0 : index
    %c0_2 = arith.constant 0 : index
    %3 = vector.load %arg2[%c0, %c0_1, %c0_2] : memref<1x16x128xf32, #tpu.memory_space<vmem>>, vector<1x16x128xf32>
    %4 = vector.shape_cast %3 : vector<1x16x128xf32> to vector<16x128xf32>
    %c0_3 = arith.constant 0 : index
    %c0_4 = arith.constant 0 : index
    %c0_5 = arith.constant 0 : index
    %5 = vector.load %arg3[%c0_3, %c0_4, %c0_5] : memref<1x8x16xf32, #tpu.memory_space<vmem>>, vector<1x8x16xf32>
    %6 = vector.shape_cast %5 : vector<1x8x16xf32> to vector<8x16xf32>
    %c0_6 = arith.constant 0 : index
    %c0_7 = arith.constant 0 : index
    %7 = vector.load %arg4[%c0_6, %c0_7] : memref<16x16xf32, #tpu.memory_space<vmem>>, vector<16x16xf32>
    %cst = arith.constant dense<0.000000e+00> : vector<16x128xf32>
    %8 = tpu.matmul %7, %4, %cst {dimension_numbers = #tpu.dot_dimension_numbers<[1], [0], [0], [1], [0, 0, 1, 1], [], []>} : vector<16x16xf32>, vector<16x128xf32>, vector<16x128xf32> -> vector<16x128xf32>
    %c0_8 = arith.constant 0 : index
    %c0_9 = arith.constant 0 : index
    %9 = vector.load %arg5[%c0_8, %c0_9] : memref<16x1xf32, #tpu.memory_space<vmem>>, vector<16x1xf32>
    %10 = vector.broadcast %9 : vector<16x1xf32> to vector<16x128xf32>
    %11 = arith.addf %8, %10 : vector<16x128xf32>
    %cst_10 = arith.constant dense<0.000000e+00> : vector<8x128xf32>
    %12 = tpu.matmul %6, %11, %cst_10 {dimension_numbers = #tpu.dot_dimension_numbers<[1], [0], [0], [1], [0, 0, 1, 1], [], []>} : vector<8x16xf32>, vector<16x128xf32>, vector<8x128xf32> -> vector<8x128xf32>
    %c0_11 = arith.constant 0 : index
    %c0_12 = arith.constant 0 : index
    %13 = vector.load %arg6[%c0_11, %c0_12] : memref<16x8xf32, #tpu.memory_space<vmem>>, vector<16x8xf32>
    %cst_13 = arith.constant dense<0.000000e+00> : vector<16x128xf32>
    %14 = tpu.matmul %13, %12, %cst_13 {dimension_numbers = #tpu.dot_dimension_numbers<[1], [0], [0], [1], [0, 0, 1, 1], [], []>} : vector<16x8xf32>, vector<8x128xf32>, vector<16x128xf32> -> vector<16x128xf32>
    %cst_14 = arith.constant dense<0.000000e+00> : vector<16xf32>
    %15 = vector.multi_reduction <add>, %14, %cst_14 [1] : vector<16x128xf32> to vector<16xf32>
    %16 = vector.shape_cast %15 : vector<16xf32> to vector<16x1xf32>
    %17 = arith.mulf %14, %14 : vector<16x128xf32>
    %cst_15 = arith.constant dense<0.000000e+00> : vector<16xf32>
    %18 = vector.multi_reduction <add>, %17, %cst_15 [1] : vector<16x128xf32> to vector<16xf32>
    %19 = vector.shape_cast %18 : vector<16xf32> to vector<16x1xf32>
    %c0_16 = arith.constant 0 : index
    %c0_17 = arith.constant 0 : index
    %c0_18 = arith.constant 0 : index
    %20 = vector.load %arg7[%c0_16, %c0_17, %c0_18] : memref<1x16x2xf32, #tpu.memory_space<vmem>>, vector<1x16x2xf32>
    %21 = vector.shape_cast %20 : vector<1x16x2xf32> to vector<16x2xf32>
    %22 = tpu.concatenate %16, %19 in 1 : vector<16x1xf32>, vector<16x1xf32> -> vector<16x2xf32>
    %23 = arith.addf %21, %22 : vector<16x2xf32>
    %c0_19 = arith.constant 0 : index
    %c0_20 = arith.constant 0 : index
    %c0_21 = arith.constant 0 : index
    %24 = vector.load %arg7[%c0_19, %c0_20, %c0_21] : memref<1x16x2xf32, #tpu.memory_space<vmem>>, vector<1x16x2xf32>
    %25 = vector.shape_cast %24 : vector<1x16x2xf32> to vector<16x2xf32>
    %26 = vector.shape_cast %23 : vector<16x2xf32> to vector<1x16x2xf32>
    tpu.vector_store %arg7[%c0_19, %c0_20, %c0_21], %26 {strides = array<i32>} : memref<1x16x2xf32, #tpu.memory_space<vmem>>, vector<1x16x2xf32>,
    return
  }
  func.func @transform_0(%arg0: i32, %arg1: i32) -> (i32, i32, i32) {
    %c0_i32 = arith.constant 0 : i32
    %c0_i32_0 = arith.constant 0 : i32
    return %arg0, %c0_i32, %arg1 : i32, i32, i32
  }
  func.func @transform_1(%arg0: i32, %arg1: i32) -> (i32, i32, i32) {
    %c0_i32 = arith.constant 0 : i32
    %c0_i32_0 = arith.constant 0 : i32
    %c0_i32_1 = arith.constant 0 : i32
    return %arg0, %c0_i32, %c0_i32_0 : i32, i32, i32
  }
  func.func @transform_2(%arg0: i32, %arg1: i32) -> (i32, i32) {
    %c0_i32 = arith.constant 0 : i32
    %c0_i32_0 = arith.constant 0 : i32
    %c0_i32_1 = arith.constant 0 : i32
    return %c0_i32, %c0_i32_0 : i32, i32
  }
  func.func @transform_3(%arg0: i32, %arg1: i32) -> (i32, i32) {
    %c0_i32 = arith.constant 0 : i32
    %c0_i32_0 = arith.constant 0 : i32
    %c0_i32_1 = arith.constant 0 : i32
    return %c0_i32, %c0_i32_0 : i32, i32
  }
  func.func @transform_4(%arg0: i32, %arg1: i32) -> (i32, i32) {
    %c0_i32 = arith.constant 0 : i32
    %c0_i32_0 = arith.constant 0 : i32
    %c0_i32_1 = arith.constant 0 : i32
    return %c0_i32, %c0_i32_0 : i32, i32
  }
  func.func @transform_5(%arg0: i32, %arg1: i32) -> (i32, i32, i32) {
    %c0_i32 = arith.constant 0 : i32
    %c0_i32_0 = arith.constant 0 : i32
    %c0_i32_1 = arith.constant 0 : i32
    return %arg0, %c0_i32, %c0_i32_0 : i32, i32, i32
  }
}

module attributes {stable_mosaic.version = 11 : i64} {
  func.func @_rel_kernel(%arg0: i32, %arg1: i32, %arg2: memref<1x16x128xf32, #tpu.memory_space<vmem>>, %arg3: memref<8x16xf32, #tpu.memory_space<vmem>>, %arg4: memref<8x1xf32, #tpu.memory_space<vmem>>, %arg5: memref<16x16xf32, #tpu.memory_space<vmem>>, %arg6: memref<16x1xf32, #tpu.memory_space<vmem>>, %arg7: memref<8x8xf32, #tpu.memory_space<vmem>>, %arg8: memref<16x16xf32, #tpu.memory_space<vmem>>, %arg9: memref<8x16xf32, #tpu.memory_space<vmem>>, %arg10: memref<1x8x16xf32, #tpu.memory_space<vmem>>, %arg11: memref<8x16xf32, #tpu.memory_space<vmem>>) attributes {dimension_semantics = [#tpu.dimension_semantics<parallel>, #tpu.dimension_semantics<arbitrary>], iteration_bounds = array<i64: 2, 2>, scalar_prefetch = 0 : i64, scratch_operands = 1 : i64, tpu.core_type = #tpu.core_type<tc>, window_params = [{transform_indices = @transform_0, window_bounds = array<i64: 1, 16, 128>}, {pipeline_mode = #tpu.pipeline_mode<synchronous>, transform_indices = @transform_1, window_bounds = array<i64: 8, 16>}, {pipeline_mode = #tpu.pipeline_mode<synchronous>, transform_indices = @transform_2, window_bounds = array<i64: 8, 1>}, {pipeline_mode = #tpu.pipeline_mode<synchronous>, transform_indices = @transform_3, window_bounds = array<i64: 16, 16>}, {pipeline_mode = #tpu.pipeline_mode<synchronous>, transform_indices = @transform_4, window_bounds = array<i64: 16, 1>}, {pipeline_mode = #tpu.pipeline_mode<synchronous>, transform_indices = @transform_5, window_bounds = array<i64: 8, 8>}, {pipeline_mode = #tpu.pipeline_mode<synchronous>, transform_indices = @transform_6, window_bounds = array<i64: 16, 16>}, {pipeline_mode = #tpu.pipeline_mode<synchronous>, transform_indices = @transform_7, window_bounds = array<i64: 8, 16>}, {transform_indices = @transform_8, window_bounds = array<i64: 1, 8, 16>}]} {
    %c0_i32 = arith.constant 0 : i32
    %0 = arith.cmpi eq, %arg1, %c0_i32 : i32
    %1 = arith.extui %0 : i1 to i32
    %c0_i32_0 = arith.constant 0 : i32
    %2 = arith.cmpi ne, %1, %c0_i32_0 : i32
    scf.if %2 {
      %cst_18 = arith.constant 0.000000e+00 : f32
      %22 = vector.broadcast %cst_18 : f32 to vector<8x16xf32>
      %c0_19 = arith.constant 0 : index
      %c0_20 = arith.constant 0 : index
      %23 = vector.load %arg11[%c0_19, %c0_20] : memref<8x16xf32, #tpu.memory_space<vmem>>, vector<8x16xf32>
      tpu.vector_store %arg11[%c0_19, %c0_20], %22 {strides = array<i32>} : memref<8x16xf32, #tpu.memory_space<vmem>>, vector<8x16xf32>,
    } else {
    }
    %c0 = arith.constant 0 : index
    %c0_1 = arith.constant 0 : index
    %c0_2 = arith.constant 0 : index
    %3 = vector.load %arg2[%c0, %c0_1, %c0_2] : memref<1x16x128xf32, #tpu.memory_space<vmem>>, vector<1x16x128xf32>
    %4 = vector.shape_cast %3 : vector<1x16x128xf32> to vector<16x128xf32>
    %c0_3 = arith.constant 0 : index
    %c0_4 = arith.constant 0 : index
    %5 = vector.load %arg3[%c0_3, %c0_4] : memref<8x16xf32, #tpu.memory_space<vmem>>, vector<8x16xf32>
    %cst = arith.constant dense<0.000000e+00> : vector<8x128xf32>
    %6 = tpu.matmul %5, %4, %cst {dimension_numbers = #tpu.dot_dimension_numbers<[1], [0], [0], [1], [0, 0, 1, 1], [], []>} : vector<8x16xf32>, vector<16x128xf32>, vector<8x128xf32> -> vector<8x128xf32>
    %c0_5 = arith.constant 0 : index
    %c0_6 = arith.constant 0 : index
    %7 = vector.load %arg4[%c0_5, %c0_6] : memref<8x1xf32, #tpu.memory_space<vmem>>, vector<8x1xf32>
    %8 = vector.broadcast %7 : vector<8x1xf32> to vector<8x128xf32>
    %9 = arith.addf %6, %8 : vector<8x128xf32>
    %c0_7 = arith.constant 0 : index
    %c0_8 = arith.constant 0 : index
    %10 = vector.load %arg5[%c0_7, %c0_8] : memref<16x16xf32, #tpu.memory_space<vmem>>, vector<16x16xf32>
    %cst_9 = arith.constant dense<0.000000e+00> : vector<16x128xf32>
    %11 = tpu.matmul %10, %4, %cst_9 {dimension_numbers = #tpu.dot_dimension_numbers<[1], [0], [0], [1], [0, 0, 1, 1], [], []>} : vector<16x16xf32>, vector<16x128xf32>, vector<16x128xf32> -> vector<16x128xf32>
    %c0_10 = arith.constant 0 : index
    %c0_11 = arith.constant 0 : index
    %12 = vector.load %arg6[%c0_10, %c0_11] : memref<16x1xf32, #tpu.memory_space<vmem>>, vector<16x1xf32>
    %13 = vector.broadcast %12 : vector<16x1xf32> to vector<16x128xf32>
    %14 = arith.addf %11, %13 : vector<16x128xf32>
    %c0_12 = arith.constant 0 : index
    %c0_13 = arith.constant 0 : index
    %15 = vector.load %arg11[%c0_12, %c0_13] : memref<8x16xf32, #tpu.memory_space<vmem>>, vector<8x16xf32>
    %cst_14 = arith.constant dense<0.000000e+00> : vector<8x16xf32>
    %16 = tpu.matmul %9, %14, %cst_14 {dimension_numbers = #tpu.dot_dimension_numbers<[1], [1], [0], [0], [0, 0, 1, 0], [], []>} : vector<8x128xf32>, vector<16x128xf32>, vector<8x16xf32> -> vector<8x16xf32>
    %17 = arith.addf %15, %16 : vector<8x16xf32>
    %c0_15 = arith.constant 0 : index
    %c0_16 = arith.constant 0 : index
    %18 = vector.load %arg11[%c0_15, %c0_16] : memref<8x16xf32, #tpu.memory_space<vmem>>, vector<8x16xf32>
    tpu.vector_store %arg11[%c0_15, %c0_16], %17 {strides = array<i32>} : memref<8x16xf32, #tpu.memory_space<vmem>>, vector<8x16xf32>,
    %c1_i32 = arith.constant 1 : i32
    %19 = arith.cmpi eq, %arg1, %c1_i32 : i32
    %20 = arith.extui %19 : i1 to i32
    %c0_i32_17 = arith.constant 0 : i32
    %21 = arith.cmpi ne, %20, %c0_i32_17 : i32
    scf.if %21 {
      %c0_18 = arith.constant 0 : index
      %c0_19 = arith.constant 0 : index
      %22 = vector.load %arg11[%c0_18, %c0_19] : memref<8x16xf32, #tpu.memory_space<vmem>>, vector<8x16xf32>
      %c0_20 = arith.constant 0 : index
      %c0_21 = arith.constant 0 : index
      %23 = vector.load %arg7[%c0_20, %c0_21] : memref<8x8xf32, #tpu.memory_space<vmem>>, vector<8x8xf32>
      %cst_22 = arith.constant dense<0.000000e+00> : vector<8x16xf32>
      %24 = tpu.matmul %23, %22, %cst_22 {dimension_numbers = #tpu.dot_dimension_numbers<[1], [0], [0], [1], [0, 0, 1, 1], [], []>} : vector<8x8xf32>, vector<8x16xf32>, vector<8x16xf32> -> vector<8x16xf32>
      %c0_23 = arith.constant 0 : index
      %c0_24 = arith.constant 0 : index
      %25 = vector.load %arg8[%c0_23, %c0_24] : memref<16x16xf32, #tpu.memory_space<vmem>>, vector<16x16xf32>
      %cst_25 = arith.constant dense<0.000000e+00> : vector<8x16xf32>
      %26 = tpu.matmul %24, %25, %cst_25 {dimension_numbers = #tpu.dot_dimension_numbers<[1], [1], [0], [0], [0, 0, 1, 0], [], []>} : vector<8x16xf32>, vector<16x16xf32>, vector<8x16xf32> -> vector<8x16xf32>
      %c0_26 = arith.constant 0 : index
      %c0_27 = arith.constant 0 : index
      %27 = vector.load %arg9[%c0_26, %c0_27] : memref<8x16xf32, #tpu.memory_space<vmem>>, vector<8x16xf32>
      %28 = arith.addf %26, %27 : vector<8x16xf32>
      %c0_28 = arith.constant 0 : index
      %c0_29 = arith.constant 0 : index
      %c0_30 = arith.constant 0 : index
      %29 = vector.load %arg10[%c0_28, %c0_29, %c0_30] : memref<1x8x16xf32, #tpu.memory_space<vmem>>, vector<1x8x16xf32>
      %30 = vector.shape_cast %29 : vector<1x8x16xf32> to vector<8x16xf32>
      %31 = vector.shape_cast %28 : vector<8x16xf32> to vector<1x8x16xf32>
      tpu.vector_store %arg10[%c0_28, %c0_29, %c0_30], %31 {strides = array<i32>} : memref<1x8x16xf32, #tpu.memory_space<vmem>>, vector<1x8x16xf32>,
    } else {
    }
    return
  }
  func.func @transform_0(%arg0: i32, %arg1: i32) -> (i32, i32, i32) {
    %c0_i32 = arith.constant 0 : i32
    %c0_i32_0 = arith.constant 0 : i32
    return %arg0, %c0_i32, %arg1 : i32, i32, i32
  }
  func.func @transform_1(%arg0: i32, %arg1: i32) -> (i32, i32) {
    %c0_i32 = arith.constant 0 : i32
    %c0_i32_0 = arith.constant 0 : i32
    %c0_i32_1 = arith.constant 0 : i32
    return %c0_i32, %c0_i32_0 : i32, i32
  }
  func.func @transform_2(%arg0: i32, %arg1: i32) -> (i32, i32) {
    %c0_i32 = arith.constant 0 : i32
    %c0_i32_0 = arith.constant 0 : i32
    %c0_i32_1 = arith.constant 0 : i32
    return %c0_i32, %c0_i32_0 : i32, i32
  }
  func.func @transform_3(%arg0: i32, %arg1: i32) -> (i32, i32) {
    %c0_i32 = arith.constant 0 : i32
    %c0_i32_0 = arith.constant 0 : i32
    %c0_i32_1 = arith.constant 0 : i32
    return %c0_i32, %c0_i32_0 : i32, i32
  }
  func.func @transform_4(%arg0: i32, %arg1: i32) -> (i32, i32) {
    %c0_i32 = arith.constant 0 : i32
    %c0_i32_0 = arith.constant 0 : i32
    %c0_i32_1 = arith.constant 0 : i32
    return %c0_i32, %c0_i32_0 : i32, i32
  }
  func.func @transform_5(%arg0: i32, %arg1: i32) -> (i32, i32) {
    %c0_i32 = arith.constant 0 : i32
    %c0_i32_0 = arith.constant 0 : i32
    %c0_i32_1 = arith.constant 0 : i32
    return %c0_i32, %c0_i32_0 : i32, i32
  }
  func.func @transform_6(%arg0: i32, %arg1: i32) -> (i32, i32) {
    %c0_i32 = arith.constant 0 : i32
    %c0_i32_0 = arith.constant 0 : i32
    %c0_i32_1 = arith.constant 0 : i32
    return %c0_i32, %c0_i32_0 : i32, i32
  }
  func.func @transform_7(%arg0: i32, %arg1: i32) -> (i32, i32) {
    %c0_i32 = arith.constant 0 : i32
    %c0_i32_0 = arith.constant 0 : i32
    %c0_i32_1 = arith.constant 0 : i32
    return %c0_i32, %c0_i32_0 : i32, i32
  }
  func.func @transform_8(%arg0: i32, %arg1: i32) -> (i32, i32, i32) {
    %c0_i32 = arith.constant 0 : i32
    %c0_i32_0 = arith.constant 0 : i32
    %c0_i32_1 = arith.constant 0 : i32
    return %arg0, %c0_i32, %c0_i32_0 : i32, i32, i32
  }
}

module attributes {stable_mosaic.version = 11 : i64} {
  func.func @_out_kernel(%arg0: i32, %arg1: i32, %arg2: memref<1x16x128xf32, #tpu.memory_space<vmem>>, %arg3: memref<1x8x16xf32, #tpu.memory_space<vmem>>, %arg4: memref<16x16xf32, #tpu.memory_space<vmem>>, %arg5: memref<16x1xf32, #tpu.memory_space<vmem>>, %arg6: memref<16x8xf32, #tpu.memory_space<vmem>>, %arg7: memref<16x1xf32, #tpu.memory_space<vmem>>, %arg8: memref<16x1xf32, #tpu.memory_space<vmem>>, %arg9: memref<1x16x128xf32, #tpu.memory_space<vmem>>) attributes {dimension_semantics = [#tpu.dimension_semantics<parallel>, #tpu.dimension_semantics<parallel>], iteration_bounds = array<i64: 2, 2>, scalar_prefetch = 0 : i64, scratch_operands = 0 : i64, tpu.core_type = #tpu.core_type<tc>, window_params = [{transform_indices = @transform_0, window_bounds = array<i64: 1, 16, 128>}, {transform_indices = @transform_1, window_bounds = array<i64: 1, 8, 16>}, {pipeline_mode = #tpu.pipeline_mode<synchronous>, transform_indices = @transform_2, window_bounds = array<i64: 16, 16>}, {pipeline_mode = #tpu.pipeline_mode<synchronous>, transform_indices = @transform_3, window_bounds = array<i64: 16, 1>}, {pipeline_mode = #tpu.pipeline_mode<synchronous>, transform_indices = @transform_4, window_bounds = array<i64: 16, 8>}, {pipeline_mode = #tpu.pipeline_mode<synchronous>, transform_indices = @transform_5, window_bounds = array<i64: 16, 1>}, {pipeline_mode = #tpu.pipeline_mode<synchronous>, transform_indices = @transform_6, window_bounds = array<i64: 16, 1>}, {transform_indices = @transform_7, window_bounds = array<i64: 1, 16, 128>}]} {
    %c0 = arith.constant 0 : index
    %c0_0 = arith.constant 0 : index
    %c0_1 = arith.constant 0 : index
    %0 = vector.load %arg2[%c0, %c0_0, %c0_1] : memref<1x16x128xf32, #tpu.memory_space<vmem>>, vector<1x16x128xf32>
    %1 = vector.shape_cast %0 : vector<1x16x128xf32> to vector<16x128xf32>
    %c0_2 = arith.constant 0 : index
    %c0_3 = arith.constant 0 : index
    %c0_4 = arith.constant 0 : index
    %2 = vector.load %arg3[%c0_2, %c0_3, %c0_4] : memref<1x8x16xf32, #tpu.memory_space<vmem>>, vector<1x8x16xf32>
    %3 = vector.shape_cast %2 : vector<1x8x16xf32> to vector<8x16xf32>
    %c0_5 = arith.constant 0 : index
    %c0_6 = arith.constant 0 : index
    %4 = vector.load %arg4[%c0_5, %c0_6] : memref<16x16xf32, #tpu.memory_space<vmem>>, vector<16x16xf32>
    %cst = arith.constant dense<0.000000e+00> : vector<16x128xf32>
    %5 = tpu.matmul %4, %1, %cst {dimension_numbers = #tpu.dot_dimension_numbers<[1], [0], [0], [1], [0, 0, 1, 1], [], []>} : vector<16x16xf32>, vector<16x128xf32>, vector<16x128xf32> -> vector<16x128xf32>
    %c0_7 = arith.constant 0 : index
    %c0_8 = arith.constant 0 : index
    %6 = vector.load %arg5[%c0_7, %c0_8] : memref<16x1xf32, #tpu.memory_space<vmem>>, vector<16x1xf32>
    %7 = vector.broadcast %6 : vector<16x1xf32> to vector<16x128xf32>
    %8 = arith.addf %5, %7 : vector<16x128xf32>
    %cst_9 = arith.constant dense<0.000000e+00> : vector<8x128xf32>
    %9 = tpu.matmul %3, %8, %cst_9 {dimension_numbers = #tpu.dot_dimension_numbers<[1], [0], [0], [1], [0, 0, 1, 1], [], []>} : vector<8x16xf32>, vector<16x128xf32>, vector<8x128xf32> -> vector<8x128xf32>
    %c0_10 = arith.constant 0 : index
    %c0_11 = arith.constant 0 : index
    %10 = vector.load %arg6[%c0_10, %c0_11] : memref<16x8xf32, #tpu.memory_space<vmem>>, vector<16x8xf32>
    %cst_12 = arith.constant dense<0.000000e+00> : vector<16x128xf32>
    %11 = tpu.matmul %10, %9, %cst_12 {dimension_numbers = #tpu.dot_dimension_numbers<[1], [0], [0], [1], [0, 0, 1, 1], [], []>} : vector<16x8xf32>, vector<8x128xf32>, vector<16x128xf32> -> vector<16x128xf32>
    %c0_13 = arith.constant 0 : index
    %c0_14 = arith.constant 0 : index
    %12 = vector.load %arg7[%c0_13, %c0_14] : memref<16x1xf32, #tpu.memory_space<vmem>>, vector<16x1xf32>
    %13 = vector.broadcast %12 : vector<16x1xf32> to vector<16x128xf32>
    %14 = arith.mulf %11, %13 : vector<16x128xf32>
    %15 = arith.addf %1, %14 : vector<16x128xf32>
    %c0_15 = arith.constant 0 : index
    %c0_16 = arith.constant 0 : index
    %16 = vector.load %arg8[%c0_15, %c0_16] : memref<16x1xf32, #tpu.memory_space<vmem>>, vector<16x1xf32>
    %17 = vector.broadcast %16 : vector<16x1xf32> to vector<16x128xf32>
    %18 = arith.addf %15, %17 : vector<16x128xf32>
    %c0_17 = arith.constant 0 : index
    %c0_18 = arith.constant 0 : index
    %c0_19 = arith.constant 0 : index
    %19 = vector.load %arg9[%c0_17, %c0_18, %c0_19] : memref<1x16x128xf32, #tpu.memory_space<vmem>>, vector<1x16x128xf32>
    %20 = vector.shape_cast %19 : vector<1x16x128xf32> to vector<16x128xf32>
    %21 = vector.shape_cast %18 : vector<16x128xf32> to vector<1x16x128xf32>
    tpu.vector_store %arg9[%c0_17, %c0_18, %c0_19], %21 {strides = array<i32>} : memref<1x16x128xf32, #tpu.memory_space<vmem>>, vector<1x16x128xf32>,
    return
  }
  func.func @transform_0(%arg0: i32, %arg1: i32) -> (i32, i32, i32) {
    %c0_i32 = arith.constant 0 : i32
    %c0_i32_0 = arith.constant 0 : i32
    return %arg0, %c0_i32, %arg1 : i32, i32, i32
  }
  func.func @transform_1(%arg0: i32, %arg1: i32) -> (i32, i32, i32) {
    %c0_i32 = arith.constant 0 : i32
    %c0_i32_0 = arith.constant 0 : i32
    %c0_i32_1 = arith.constant 0 : i32
    return %arg0, %c0_i32, %c0_i32_0 : i32, i32, i32
  }
  func.func @transform_2(%arg0: i32, %arg1: i32) -> (i32, i32) {
    %c0_i32 = arith.constant 0 : i32
    %c0_i32_0 = arith.constant 0 : i32
    %c0_i32_1 = arith.constant 0 : i32
    return %c0_i32, %c0_i32_0 : i32, i32
  }
  func.func @transform_3(%arg0: i32, %arg1: i32) -> (i32, i32) {
    %c0_i32 = arith.constant 0 : i32
    %c0_i32_0 = arith.constant 0 : i32
    %c0_i32_1 = arith.constant 0 : i32
    return %c0_i32, %c0_i32_0 : i32, i32
  }
  func.func @transform_4(%arg0: i32, %arg1: i32) -> (i32, i32) {
    %c0_i32 = arith.constant 0 : i32
    %c0_i32_0 = arith.constant 0 : i32
    %c0_i32_1 = arith.constant 0 : i32
    return %c0_i32, %c0_i32_0 : i32, i32
  }
  func.func @transform_5(%arg0: i32, %arg1: i32) -> (i32, i32) {
    %c0_i32 = arith.constant 0 : i32
    %c0_i32_0 = arith.constant 0 : i32
    %c0_i32_1 = arith.constant 0 : i32
    return %c0_i32, %c0_i32_0 : i32, i32
  }
  func.func @transform_6(%arg0: i32, %arg1: i32) -> (i32, i32) {
    %c0_i32 = arith.constant 0 : i32
    %c0_i32_0 = arith.constant 0 : i32
    %c0_i32_1 = arith.constant 0 : i32
    return %c0_i32, %c0_i32_0 : i32, i32
  }
  func.func @transform_7(%arg0: i32, %arg1: i32) -> (i32, i32, i32) {
    %c0_i32 = arith.constant 0 : i32
    %c0_i32_0 = arith.constant 0 : i32
    return %arg0, %c0_i32, %arg1 : i32, i32, i32
  }
}

</mosaic_0001>

<bundles_post_ra>
// kernel: glore_unit_forward.4
= control target key start
LH: loop header
LB: loop body
LE: loop exit
PB: predicated region body
PF: predicated region fallthrough
CT: control target
= control target key end

     0   :  { %s867_s18 = smov 0   ;;  %s869_s19 = smov 0   ;;  %s992_s0 = inlined_call_operand.vmem [shape: f32[2,16,256], index: 0, kind: input, shape index: {}]   ;;  %s993_s1 = inlined_call_operand.vmem [shape: f32[2,8,16], index: 1, kind: input, shape index: {}]   ;;  %s994_s2 = inlined_call_operand.vmem [shape: f32[16,16], index: 2, kind: input, shape index: {}]   ;;  %s995_s3 = inlined_call_operand.vmem [shape: f32[16,1], index: 3, kind: input, shape index: {}]   ;;  %s996_s4 = inlined_call_operand.vmem [shape: f32[16,8], index: 4, kind: input, shape index: {}]   ;;  %s997_s5 = inlined_call_operand.vmem [shape: f32[2,16,2], index: 5, kind: output, shape index: {}]  }
   0x1   :  { %s871_s20 = smov 0   ;;  %s873_s21 = smov 0  }
   0x2   :  { %s875_s22 = smov 0   ;;  %s877_s23 = smov 0  }
   0x3   :  { %s879_s24 = smov 0  }
   0x4 LB: > { %s24_s25 = sadd.s32 1, %s823_s22  ;;  %s27_s26 = sadd.s32 1, %s827_s23  ;;  %s831_s24 = sphi %s879_s24, %s15_s24   ;;  %s827_s23 = sphi %s877_s23, %s1003_s23   ;;  %s823_s22 = sphi %s875_s22, %s1002_s22   ;;  %s819_s21 = sphi %s873_s21, %s1001_s21   ;;  %s815_s20 = sphi %s871_s20, %s1000_s20   ;;  %s811_s19 = sphi %s869_s19, %s999_s19   ;;  %s807_s18 = sphi %s867_s18, %s998_s18  }
   0x5   : > { %p25_p0 = scmp.ge.s32.totalorder %s24_s25, 2  ;;  %p43_p1 = scmp.ne.s32.totalorder %s811_s19, %s807_s18 }
   0x6   : > { %p44_p2 = scmp.eq.s32.totalorder %s831_s24, 0  ;;  %s36_s30 = sadd.s32 1, %s811_s19 }
   0x7   : > { %s1005_s25 = smov (%p25_p0, %s24_s25), 0  ;;  %s1007_s26 = smov (!%p25_p0, %s27_s26), %s827_s23 }
   0x8   : > { %p45_p3 = por %p44_p2, %p43_p1  ;;  %p29_p4 = scmp.ge.s32.totalorder %s1007_s26, 2 }
   0x9   : > { %s32_s27 = ssub.s32 %s823_s22, %s1005_s25  ;;  %p669_p6 = scmp.ge.s32.totalorder %s831_s24, 4 }
   0xa   : > { %s1009_s26 = smov (%p29_p4, %s1007_s26), 0 }
   0xb   : > { %s31_s28 = ssub.s32 %s827_s23, %s1009_s26  ;;  %193 = sbr.rel (%p669_p6) target bundleno = 23 (0x17), region = 28 }
   0xc   : > { %s33_s29 = sor.u32 %s32_s27, %s31_s28 }
   0xd   : > { %p34_p5 = scmp.eq.s32.totalorder %s33_s29, 0 }
   0xf   : > { %s918_s6 = scalar_select %p34_p5, %s811_s19, %s36_s30  }
  0x10   : > { %196 = sbr.rel (!%p45_p3) target bundleno = 23 (0x17), region = 32  ;;  %s198_s7 = sand.u32 (%p45_p3), 1, %s811_s19  }
  0x11   : > { %s671_s8 = sshll.u32 (%p45_p3), %s827_s23, 2  ;;  %s670_s9 = sshll.u32 (%p45_p3), %s198_s7, 4 }
  0x12   : > { %s202_s10 = sadd.s32 (%p45_p3), %s823_s22, %s671_s8  ;;  %s200_s15 = scalar_lea.vmem (%p45_p3), [#allocation2], %s670_s9 }
  0x13   : > { %s672_s11 = sshll.u32 (%p45_p3), %s202_s10, 3 }
  0x14   : > { %s204_s14 = scalar_lea.vmem (%p45_p3), %s992_s0, %s672_s11 }
  0x15   : > { %v235_v0 = vld [vmem:[%s204_s14] sm:$0xff]  ;;  %v237_v1 = vld [vmem:[%s204_s14 + $0x10] sm:$0xff] }
  0x16   : > { %236 = vst [vmem:[%s200_s15] sm:$0xff] %v235_v0  ;;  %238 = vst [vmem:[%s200_s15 + $0x8] sm:$0xff] %v237_v1 }
  0x17 PF: > { %p673_p7 = scmp.ge.s32.totalorder %s831_s24, 1  ;;  %p250_p8 = scmp.lt.s32.totalorder %s831_s24, 5 }
  0x19   : > { %p251_p9 = pnand %p673_p7, %p250_p8 }
  0x1a   : > { %s257_s16 = sand.u32 (!%p251_p9), 1, %s807_s18   ;;  %p288_p10 = scmp.lt.s32.totalorder (!%p251_p9), %s819_s21, 1 }
  0x1b   : > { %254 = sbr.rel (%p251_p9) target bundleno = 780 (0x30c), region = 74  ;;  %s674_s17 = sshll.u32 (!%p251_p9), %s257_s16, 4 }
  0x1c   : > { %s259_s11 = scalar_lea.vmem (!%p251_p9), [#allocation2], %s674_s17  ;;  %p678_p11 = scmp.ne.s32.totalorder (!%p251_p9), %s815_s20, 0 }
  0x20   : > { %s1011_s21 = smov (!%p288_p10, %s819_s21), 1  ;;  %300 = sbr.rel (%p678_p11) target bundleno = 39 (0x27), region = 82 }
  0x21   : > { %s675_s27 = sshll.u32 %s1011_s21, 3  ;;  %s686_s28 = sshll.u32 %s1011_s21, 4 }
  0x22   : > { %s935_s7 = scalar_lea.vmem %s993_s1, %s675_s27  ;;  %s940_s10 = scalar_lea.vmem %s997_s5, %s686_s28 }
  0x25   : > { %vm301_vm0 = vcmask 15360   ;;  %v833_v2 = vmov 0.0  }
  0x26   : > { %302 = vst.msk [vmem:[%s940_s10] sm:$0xff] %vm301_vm0, %v833_v2  ;;  %303 = vst.msk [vmem:[%s940_s10 + $0x8] sm:$0xff] %vm301_vm0, %v833_v2 }
  0x27 PF: > { %v305_v3 = vld [vmem:[%s259_s11 + $0x8] sm:$0xff]  ;;  %v304_v4 = vld [vmem:[%s259_s11] sm:$0xff]  ;;  %vm321_vm1 = vcmask 130048   ;;  %v834_v8 = vmov 0   ;;  %v835_v10 = vmov 0.0   ;;  %vm836_vm2 = vmmov 0  }
  0x28   : > { %v307_v5 = vld [vmem:[%s994_s2] sm:$0xff]  ;;  %697 = vmatprep.subr.mxu0 %v305_v3  ;;  %v310_v6 = vld [vmem:[%s995_s3 + $0x8] sm:$0xff]  ;;  %776 = vset.pattern.permute.xlu0 %v834_v8  ;;  %vm478_vm3 = vcmask 64512   ;;  %vm572_vm4 = vcmask 7168   ;;  %vm577_vm5 = vcmask 15360  }
  0x29   : > { %701 = vmatprep.mubr.msk.f32.mxu0 %vm321_vm1, %v307_v5  ;;  %698 = vmatpush3.msra.mxu0 %v305_v3  ;;  %v308_v7 = vld [vmem:[%s994_s2 + $0x8] sm:$0xff]  ;;  %v309_v9 = vld [vmem:[%s995_s3] sm:$0xff] }
  0x2a   : > { %699 = vmatprep.subr.mxu0 %v304_v4  ;;  %318 = vperm.xlu0 %776, %v310_v6   ;;  %v306_v17 = vld [vmem:[%s935_s7] sm:$0xff]  ;;  %v477_v20 = vld [vmem:[%s996_s4 + $0x8] sm:$0xff] }
  0x2b   : > { %700 = vmatpush3.msra.mxu0 %v304_v4  ;;  %704 = vmatprep.subr.mxu1 %v835_v10  ;;  %v476_v18 = vld [vmem:[%s996_s4] sm:$0xff] }
  0x2c   : > { %702 = vmatmul.mubr.msk.f32.vlgmr.msra.gmra.mxu0 %vm321_vm1, %v308_v7  ;;  %708 = vmatprep.mubr.msk.f32.mxu1 %vm836_vm2, %v835_v10 }
  0x2d   : > { %713 = vmatprep.mubr.msk.f32.mxu0 %vm478_vm3, %v476_v18  ;;  %v570_v27 = vld [vmem:[%s940_s10] sm:$0xff]  ;;  %v571_v32 = vld [vmem:[%s940_s10 + $0x8] sm:$0xff] }
  0x2e   : > { %313 = vperm.xlu0 %776, %v309_v9  }
  0xa5   : > { %v319_v11 = vpop.permute.xlu0 %318 }
  0xa9   : > { %v314_v14 = vpop.permute.xlu0 %313 }
  0xec   : > { %v703_v12 = vpop.f32.mrf.mxu0 }
  0xed   : > { %v400_v13 = vadd.f32 %v703_v12, %v319_v11 }
  0xee   : > { %v394_v15 = vpop.f32.mrf.mxu0 }
  0xef   : > { %v395_v16 = vadd.f32 %v394_v15, %v314_v14  ;;  %705 = vmatpush3.msra.mxu1 %v400_v13 }
  0xf0   : > { %706 = vmatprep.subr.mxu1 %v835_v10 }
  0xf1   : > { %707 = vmatpush3.msra.mxu1 %v395_v16 }
  0xf2   : > { %709 = vmatmul.mubr.msk.f32.vlgmr.msra.gmra.mxu1 %vm321_vm1, %v306_v17 }
 0x1b2   : > { %v472_v19 = vpop.f32.mrf.mxu1 }
 0x1b3   : > { %711 = vmatprep.subr.mxu0 %v472_v19 }
 0x1b4   : > { %v710_v21 = vpop.f32.mrf.mxu1  ;;  %712 = vmatpush3.msra.mxu0 %v472_v19 }
 0x1b5   : > { %714 = vmatmul.mubr.msk.f32.vlgmr.msra.gmra.mxu0 %vm478_vm3, %v477_v20 }
 0x275   : > { %v715_v22 = vpop.f32.mrf.mxu0 }
 0x276   : > { %562 = vadd.xlane.f32.xlu1 %v715_v22  ;;  %v565_v25 = vmul.f32 %v715_v22, %v715_v22 }
 0x277   : > { %v551_v23 = vpop.f32.mrf.mxu0 }
 0x278   : > { %v564_v24 = vmul.f32 %v551_v23, %v551_v23 }
 0x27a   : > { %560 = vadd.xlane.f32.xlu1 %v551_v23  ;;  %566 = vadd.xlane.f32.xlu0 %v564_v24 }
 0x27e   : > { %568 = vadd.xlane.f32.xlu1 %v565_v25 }
 0x2ff   : > { %v563_v26 = vpop.xlane.xlu1 %562 }
 0x303   : > { %v561_v28 = vpop.xlane.xlu1 %560  ;;  %v567_v29 = vpop.xlane.xlu0 %566 }
 0x304   : > { %v573_v30 = vsel %vm572_vm4, %v561_v28, %v567_v29 }
 0x305   : > { %v575_v31 = vadd.f32 %v573_v30, %v570_v27 }
 0x307   : > { %578 = vst.msk [vmem:[%s940_s10] sm:$0xff] %vm577_vm5, %v575_v31  ;;  %v569_v33 = vpop.xlane.xlu1 %568 }
 0x308   : > { %v574_v34 = vsel %vm572_vm4, %v563_v26, %v569_v33 }
 0x309   : > { %v576_v35 = vadd.f32 %v574_v34, %v571_v32 }
 0x30b   : > { %579 = vst.msk [vmem:[%s940_s10 + $0x8] sm:$0xff] %vm577_vm5, %v576_v35 }
 0x30c PF: > { %s15_s24 = sadd.s32 1, %s831_s24   ;;  %s998_s18 = smov %s811_s19 }
 0x30d   : > { %p12_p12 = scmp.ge.s32.totalorder %s15_s24, 6   ;;  %s999_s19 = smov %s918_s6 }
 0x30e   : > { %s1000_s20 = smov %s823_s22  ;;  %s1001_s21 = smov %s827_s23 }
 0x30f   : > { %s1002_s22 = smov %s1005_s25  ;;  %s1003_s23 = smov %s1009_s26 }
 0x310   :  { %14 = sbr.rel (!%p12_p12) target bundleno = 4 (0x4), region = 120 }

// kernel: glore_unit_forward.3
= control target key start
LH: loop header
LB: loop body
LE: loop exit
PB: predicated region body
PF: predicated region fallthrough
CT: control target
= control target key end

     0   :  { %s1091_s27 = smov 0   ;;  %s1093_s28 = smov 0   ;;  %s1225_s0 = inlined_call_operand.vmem [shape: f32[2,16,256], index: 0, kind: input, shape index: {}]   ;;  %s1226_s1 = inlined_call_operand.vmem [shape: f32[8,16], index: 1, kind: input, shape index: {}]   ;;  %s1227_s2 = inlined_call_operand.vmem [shape: f32[8,1], index: 2, kind: input, shape index: {}]   ;;  %s1228_s3 = inlined_call_operand.vmem [shape: f32[16,16], index: 3, kind: input, shape index: {}]   ;;  %s1229_s4 = inlined_call_operand.vmem [shape: f32[16,1], index: 4, kind: input, shape index: {}]   ;;  %s1230_s5 = inlined_call_operand.vmem [shape: f32[8,8], index: 5, kind: input, shape index: {}]   ;;  %s1231_s6 = inlined_call_operand.vmem [shape: f32[16,16], index: 6, kind: input, shape index: {}]   ;;  %s1232_s7 = inlined_call_operand.vmem [shape: f32[8,16], index: 7, kind: input, shape index: {}]   ;;  %s1233_s8 = inlined_call_operand.vmem [shape: f32[2,8,16], index: 8, kind: output, shape index: {}]  }
   0x1   :  { %s1095_s29 = smov 0   ;;  %s1097_s30 = smov 0  }
   0x2   :  { %s1099_s9 = smov 0   ;;  %s1101_s10 = smov 0  }
   0x3   :  { %s1103_s11 = smov 0  }
   0x4 LB: > { %s27_s12 = sadd.s32 1, %s1030_s9  ;;  %s30_s13 = sadd.s32 1, %s1034_s10  ;;  %s1038_s11 = sphi %s1103_s11, %s18_s11   ;;  %s1034_s10 = sphi %s1101_s10, %s1239_s10   ;;  %s1030_s9 = sphi %s1099_s9, %s1238_s9   ;;  %s1026_s30 = sphi %s1097_s30, %s1237_s30   ;;  %s1022_s29 = sphi %s1095_s29, %s1236_s29   ;;  %s1018_s28 = sphi %s1093_s28, %s1235_s28   ;;  %s1014_s27 = sphi %s1091_s27, %s1234_s27  }
   0x5   : > { %p28_p0 = scmp.ge.s32.totalorder %s27_s12, 2  ;;  %p46_p1 = scmp.ne.s32.totalorder %s1018_s28, %s1014_s27 }
   0x6   : > { %p47_p2 = scmp.eq.s32.totalorder %s1038_s11, 0  ;;  %s39_s17 = sadd.s32 1, %s1018_s28 }
   0x7   : > { %s1241_s12 = smov (%p28_p0, %s27_s12), 0  ;;  %s1243_s13 = smov (!%p28_p0, %s30_s13), %s1034_s10 }
   0x8   : > { %p48_p3 = por %p47_p2, %p46_p1  ;;  %p32_p4 = scmp.ge.s32.totalorder %s1243_s13, 2 }
   0x9   : > { %s35_s14 = ssub.s32 %s1030_s9, %s1241_s12  ;;  %p854_p6 = scmp.ge.s32.totalorder %s1038_s11, 4 }
   0xa   : > { %s1245_s13 = smov (%p32_p4, %s1243_s13), 0 }
   0xb   : > { %s34_s15 = ssub.s32 %s1034_s10, %s1245_s13  ;;  %266 = sbr.rel (%p854_p6) target bundleno = 23 (0x17), region = 44 }
   0xc   : > { %s36_s16 = sor.u32 %s35_s14, %s34_s15 }
   0xd   : > { %p37_p5 = scmp.eq.s32.totalorder %s36_s16, 0 }
   0xf   : > { %s1142_s18 = scalar_select %p37_p5, %s1018_s28, %s39_s17  }
  0x10   : > { %269 = sbr.rel (!%p48_p3) target bundleno = 23 (0x17), region = 48  ;;  %s271_s19 = sand.u32 (%p48_p3), 1, %s1018_s28  }
  0x11   : > { %s856_s20 = sshll.u32 (%p48_p3), %s1034_s10, 2  ;;  %s855_s21 = sshll.u32 (%p48_p3), %s271_s19, 4 }
  0x12   : > { %s275_s22 = sadd.s32 (%p48_p3), %s1030_s9, %s856_s20  ;;  %s273_s14 = scalar_lea.vmem (%p48_p3), [#allocation3], %s855_s21 }
  0x13   : > { %s857_s23 = sshll.u32 (%p48_p3), %s275_s22, 3 }
  0x14   : > { %s277_s26 = scalar_lea.vmem (%p48_p3), %s1225_s0, %s857_s23 }
  0x15   : > { %v308_v0 = vld [vmem:[%s277_s26] sm:$0xff]  ;;  %v310_v1 = vld [vmem:[%s277_s26 + $0x10] sm:$0xff] }
  0x16   : > { %309 = vst [vmem:[%s273_s14] sm:$0xff] %v308_v0  ;;  %311 = vst [vmem:[%s273_s14 + $0x8] sm:$0xff] %v310_v1 }
  0x17 PF: > { %p858_p7 = scmp.ge.s32.totalorder %s1038_s11, 1  ;;  %p316_p8 = scmp.lt.s32.totalorder %s1038_s11, 5 }
  0x19   : > { %p317_p9 = pnand %p858_p7, %p316_p8 }
  0x1a   : > { %s323_s15 = sand.u32 (!%p317_p9), 1, %s1014_s27   ;;  %p355_p10 = scmp.lt.s32.totalorder (!%p317_p9), %s1026_s30, 1 }
  0x1b   : > { %320 = sbr.rel (%p317_p9) target bundleno = 843 (0x34b), region = 86  ;;  %s859_s16 = sshll.u32 (!%p317_p9), %s323_s15, 4 }
  0x1c   : > { %s325_s22 = scalar_lea.vmem (!%p317_p9), [#allocation3], %s859_s16  ;;  %p861_p11 = scmp.ne.s32.totalorder (!%p317_p9), %s1022_s29, 0 }
  0x20   : > { %s1247_s30 = smov (!%p355_p10, %s1026_s30), 1  ;;  %362 = sbr.rel (%p861_p11) target bundleno = 39 (0x27), region = 94 }
  0x21   : > { %s860_s17 = sshll.u32 %s1247_s30, 3 }
  0x22   : > { %s1159_s21 = scalar_lea.vmem %s1233_s8, %s860_s17 }
  0x25   : > { %vm363_vm0 = vcmask 130048   ;;  %v1040_v2 = vmov 0.0  }
  0x26   : > { %364 = vst.msk [vmem:[#allocation2] sm:$0xff] %vm363_vm0, %v1040_v2 }
  0x27 PF: > { %v366_v3 = vld [vmem:[%s325_s22 + $0x8] sm:$0xff]  ;;  %v1041_v4 = vmov 0.0   ;;  %v365_v5 = vld [vmem:[%s325_s22] sm:$0xff]  ;;  %vm1042_vm1 = vmmov 0   ;;  %vm374_vm2 = vcmask 130048   ;;  %v1043_v8 = vmov 0  }
  0x28   : > { %887 = vmatprep.subr.mxu1 %v1041_v4  ;;  %891 = vmatprep.mubr.msk.f32.mxu1 %vm1042_vm1, %v1041_v4  ;;  %v451_v6 = vld [vmem:[%s1229_s4 + $0x8] sm:$0xff]  ;;  %v367_v7 = vld [vmem:[%s1226_s1] sm:$0xff]  ;;  %p865_p12 = scmp.ne.s32.totalorder %s1022_s29, 1 }
  0x29   : > { %888 = vmatpush3.msra.mxu1 %v366_v3  ;;  %983 = vset.pattern.permute.xlu1 %v1043_v8  ;;  %v448_v9 = vld [vmem:[%s1228_s3] sm:$0xff]  ;;  %v449_v12 = vld [vmem:[%s1228_s3 + $0x8] sm:$0xff] }
  0x2a   : > { %889 = vmatprep.subr.mxu1 %v1041_v4  ;;  %982 = vset.pattern.permute.xlu0 %v1043_v8  ;;  %v368_v10 = vld [vmem:[%s1227_s2] sm:$0xff] }
  0x2b   : > { %890 = vmatpush3.msra.mxu1 %v365_v5  ;;  %459 = vperm.xlu0 %982, %v451_v6   ;;  %v450_v11 = vld [vmem:[%s1229_s4] sm:$0xff] }
  0x2c   : > { %892 = vmatmul.mubr.msk.f32.vlgmr.msra.gmra.mxu1 %vm374_vm2, %v367_v7  ;;  %894 = vmatprep.subr.mxu1 %v366_v3 }
  0x2d   : > { %895 = vmatpush3.msra.mxu1 %v366_v3  ;;  %898 = vmatprep.mubr.msk.f32.mxu1 %vm374_vm2, %v448_v9  ;;  %v543_v23 = vld [vmem:[#allocation2] sm:$0xff] }
  0x2e   : > { %896 = vmatprep.subr.mxu1 %v365_v5  ;;  %371 = vperm.xlu1 %983, %v368_v10  }
  0x2f   : > { %897 = vmatpush3.msra.mxu1 %v365_v5  ;;  %454 = vperm.xlu0 %982, %v450_v11  }
  0x30   : > { %899 = vmatmul.mubr.msk.f32.vlgmr.msra.gmra.mxu1 %vm374_vm2, %v449_v12  ;;  %901 = vmatprep.subr.mxu0 %v1041_v4 }
  0x31   : > { %905 = vmatprep.mubr.msk.f32.mxu0 %vm1042_vm1, %v1041_v4 }
  0xa6   : > { %v460_v14 = vpop.permute.xlu0 %459 }
  0xa9   : > { %v372_v20 = vpop.permute.xlu1 %371 }
  0xaa   : > { %v455_v19 = vpop.permute.xlu0 %454 }
  0xec   : > { %v444_v13 = vpop.f32.mrf.mxu1 }
  0xed   : > { %v445_v22 = vadd.f32 %v444_v13, %v372_v20 }
  0xee   : > { %v893_v15 = vpop.f32.mrf.mxu1 }
  0xf0   : > { %v900_v16 = vpop.f32.mrf.mxu1 }
  0xf1   : > { %v540_v17 = vadd.f32 %v900_v16, %v460_v14 }
  0xf2   : > { %v534_v18 = vpop.f32.mrf.mxu1 }
  0xf3   : > { %902 = vmatpush3.xpose.msra.mxu0 %v540_v17  ;;  %v535_v21 = vadd.f32 %v534_v18, %v455_v19 }
  0xf4   : > { %903 = vmatprep.subr.mxu0 %v1041_v4 }
  0xf7   : > { %904 = vmatpush3.xpose.msra.mxu0 %v535_v21 }
  0xfa   : > { %906 = vmatmul.mubr.f32.vlgmr.msra.gmra.mxu0 %v445_v22 }
 0x1b9   : > { %619 = sbr.rel (%p865_p12) target bundleno = 843 (0x34b), region = 98 }
 0x1ba   : > { %v610_v24 = vpop.f32.mrf.mxu0 }
 0x1bb   : > { %v614_v25 = vadd.f32 %v610_v24, %v543_v23 }
 0x1bc   : > { %v907_v26 = vpop.f32.mrf.mxu0 }
 0x1bd   : > { %615 = vst.msk [vmem:[#allocation2] sm:$0xff] %vm374_vm2, %v614_v25 }
 0x1be   : > { %v621_v28 = vld [vmem:[%s1230_s5] sm:$0xff]  ;;  %vm622_vm3 = vcmask 64512   ;;  %v697_v29 = vld [vmem:[%s1231_s6 + $0x8] sm:$0xff]  ;;  %v1044_v30 = vmov 0.0   ;;  %vm1045_vm4 = vmmov 0  }
 0x1bf   : > { %908 = vmatprep.subr.mxu0 %v1044_v30  ;;  %910 = vmatprep.mubr.msk.f32.mxu0 %vm1045_vm4, %v1044_v30  ;;  %v696_v31 = vld [vmem:[%s1231_s6] sm:$0xff] }
 0x1c0   : > { %913 = vmatprep.subr.mxu1 %v1044_v30  ;;  %917 = vmatprep.mubr.msk.f32.mxu1 %vm1045_vm4, %v1044_v30  ;;  %v698_v34 = vld [vmem:[%s1232_s7] sm:$0xff] }
 0x1c1   : > { %914 = vmatpush3.xpose.msk.msra.mxu1 %vm374_vm2, %v697_v29 }
 0x1c2   : > { %915 = vmatprep.subr.mxu1 %v1044_v30 }
 0x1c4   : > { %v620_v27 = vld [vmem:[#allocation2] sm:$0xff] }
 0x1c5   : > { %909 = vmatpush3.msra.mxu0 %v620_v27  ;;  %916 = vmatpush3.xpose.msk.msra.mxu1 %vm374_vm2, %v696_v31 }
 0x1c6   : > { %911 = vmatmul.mubr.msk.f32.vlgmr.msra.gmra.mxu0 %vm622_vm3, %v621_v28 }
 0x286   : > { %v692_v32 = vpop.f32.mrf.mxu0 }
 0x287   : > { %918 = vmatmul.mubr.msk.f32.vlgmr.msra.gmra.mxu1 %vm374_vm2, %v692_v32 }
 0x288   : > { %v912_v33 = vpop.f32.mrf.mxu0 }
 0x347   : > { %v774_v35 = vpop.f32.mrf.mxu1 }
 0x348   : > { %v775_v36 = vadd.f32 %v774_v35, %v698_v34 }
 0x349   : > { %v919_v37 = vpop.f32.mrf.mxu1 }
 0x34a   : > { %778 = vst.msk [vmem:[%s1159_s21] sm:$0xff] %vm374_vm2, %v775_v36 }
 0x34b PF: > { %s18_s11 = sadd.s32 1, %s1038_s11   ;;  %s1234_s27 = smov %s1018_s28 }
 0x34c   : > { %p15_p13 = scmp.ge.s32.totalorder %s18_s11, 6   ;;  %s1235_s28 = smov %s1142_s18 }
 0x34d   : > { %s1236_s29 = smov %s1030_s9  ;;  %s1237_s30 = smov %s1034_s10 }
 0x34e   : > { %s1238_s9 = smov %s1241_s12  ;;  %s1239_s10 = smov %s1245_s13 }
 0x34f   :  { %17 = sbr.rel (!%p15_p13) target bundleno = 4 (0x4), region = 133 }

// kernel: glore_unit_forward.5
= control target key start
LH: loop header
LB: loop body
LE: loop exit
PB: predicated region body
PF: predicated region fallthrough
CT: control target
= control target key end

     0   :  { %s977_s24 = smov 0   ;;  %s979_s25 = smov 0   ;;  %s1115_s0 = inlined_call_operand.vmem [shape: f32[2,16,256], index: 0, kind: input, shape index: {}, may-alias: {0,7}]   ;;  %s1116_s1 = inlined_call_operand.vmem [shape: f32[2,8,16], index: 1, kind: input, shape index: {}]   ;;  %s1117_s2 = inlined_call_operand.vmem [shape: f32[16,16], index: 2, kind: input, shape index: {}]   ;;  %s1118_s3 = inlined_call_operand.vmem [shape: f32[16,1], index: 3, kind: input, shape index: {}]   ;;  %s1119_s4 = inlined_call_operand.vmem [shape: f32[16,8], index: 4, kind: input, shape index: {}]   ;;  %s1120_s5 = inlined_call_operand.vmem [shape: f32[16,1], index: 5, kind: input, shape index: {}]   ;;  %s1121_s6 = inlined_call_operand.vmem [shape: f32[16,1], index: 6, kind: input, shape index: {}]   ;;  %s1122_s7 = inlined_call_operand.vmem [shape: f32[2,16,256], index: 7, kind: output, shape index: {}, may-alias: {0,7}]  }
   0x1   :  { %s981_s26 = smov 0   ;;  %s983_s27 = smov 0  }
   0x2   :  { %s985_s28 = smov 0   ;;  %s987_s29 = smov 0  }
   0x3   :  { %s989_s30 = smov 0  }
   0x4 LB: > { %s26_s8 = sadd.s32 1, %s924_s28  ;;  %s29_s9 = sadd.s32 1, %s928_s29  ;;  %s932_s30 = sphi %s989_s30, %s17_s30   ;;  %s928_s29 = sphi %s987_s29, %s1129_s29   ;;  %s924_s28 = sphi %s985_s28, %s1128_s28   ;;  %s920_s27 = sphi %s983_s27, %s1127_s27   ;;  %s916_s26 = sphi %s981_s26, %s1126_s26   ;;  %s912_s25 = sphi %s979_s25, %s1125_s25   ;;  %s908_s24 = sphi %s977_s24, %s1124_s24  }
   0x5   : > { %p27_p0 = scmp.ge.s32.totalorder %s26_s8, 2  ;;  %s767_s10 = sadd.s32 4294967295, %s932_s30  }
   0x6   : > { %p45_p1 = scmp.ne.s32.totalorder %s912_s25, %s908_s24  ;;  %p46_p2 = scmp.eq.s32.totalorder %s932_s30, 0 }
   0x7   : > { %s1131_s8 = smov (%p27_p0, %s26_s8), 0  ;;  %s1133_s9 = smov (!%p27_p0, %s29_s9), %s928_s29 }
   0x8   : > { %p31_p3 = scmp.ge.s32.totalorder %s1133_s9, 2  ;;  %p208_p4 = scmp.eq.s32.totalorder %s767_s10, 3 }
   0x9   : > { %s34_s11 = ssub.s32 %s924_s28, %s1131_s8  ;;  %p47_p5 = por %p46_p2, %p45_p1 }
   0xa   : > { %s1135_s9 = smov (%p31_p3, %s1133_s9), 0  ;;  %p1025_p6 = por %p208_p4, %p45_p1 }
   0xb   : > { %s33_s13 = ssub.s32 %s928_s29, %s1135_s9  ;;  %s38_s15 = sadd.s32 1, %s912_s25 }
   0xc   : > { %s35_s14 = sor.u32 %s34_s11, %s33_s13  ;;  %p770_p8 = scmp.ge.s32.totalorder %s932_s30, 4 }
   0xd   : > { %p36_p7 = scmp.eq.s32.totalorder %s35_s14, 0 }
   0xe   : > { %245 = sbr.rel (%p770_p8) target bundleno = 26 (0x1a), region = 36 }
   0xf   : > { %s1033_s16 = scalar_select %p36_p7, %s912_s25, %s38_s15  }
  0x13   : > { %248 = sbr.rel (!%p47_p5) target bundleno = 26 (0x1a), region = 40  ;;  %s250_s17 = sand.u32 (%p47_p5), 1, %s912_s25  }
  0x14   : > { %s772_s18 = sshll.u32 (%p47_p5), %s928_s29, 2  ;;  %s771_s19 = sshll.u32 (%p47_p5), %s250_s17, 4 }
  0x15   : > { %s254_s20 = sadd.s32 (%p47_p5), %s924_s28, %s772_s18  ;;  %s252_s11 = scalar_lea.vmem (%p47_p5), [#allocation2], %s771_s19 }
  0x16   : > { %s773_s21 = sshll.u32 (%p47_p5), %s254_s20, 3 }
  0x17   : > { %s256_s10 = scalar_lea.vmem (%p47_p5), %s1115_s0, %s773_s21 }
  0x18   : > { %v287_v0 = vld [vmem:[%s256_s10] sm:$0xff]  ;;  %v289_v1 = vld [vmem:[%s256_s10 + $0x10] sm:$0xff] }
  0x19   : > { %288 = vst [vmem:[%s252_s11] sm:$0xff] %v287_v0  ;;  %290 = vst [vmem:[%s252_s11 + $0x8] sm:$0xff] %v289_v1 }
  0x1a PF: > { %p774_p9 = scmp.ge.s32.totalorder %s932_s30, 1  ;;  %p302_p10 = scmp.lt.s32.totalorder %s932_s30, 5 }
  0x1c   : > { %p303_p11 = pnand %p774_p9, %p302_p10 }
  0x1d   : > { %s309_s13 = sand.u32 (!%p303_p11), 1, %s908_s24   ;;  %p343_p12 = scmp.lt.s32.totalorder (!%p303_p11), %s920_s27, 1 }
  0x1e   : > { %306 = sbr.rel (%p303_p11) target bundleno = 645 (0x285), region = 82  ;;  %s1051_s19 = sshll.u32 (!%p303_p11), %s309_s13, 4 }
  0x1f   : > { %s311_s20 = scalar_lea.vmem (!%p303_p11), [#allocation2], %s1051_s19  ;;  %s342_s17 = scalar_lea.vmem (!%p303_p11), [#allocation3], %s1051_s19 }
  0x23   : > { %v350_v2 = vld [vmem:[%s1117_s2] sm:$0xff]  ;;  %vm364_vm0 = vcmask 130048   ;;  %v353_v3 = vld [vmem:[%s1118_s3 + $0x8] sm:$0xff]  ;;  %v934_v4 = vmov 0   ;;  %v935_v10 = vmov 0.0   ;;  %vm936_vm1 = vmmov 0  }
  0x24   : > { %802 = vmatprep.mubr.msk.f32.mxu0 %vm364_vm0, %v350_v2  ;;  %876 = vset.pattern.permute.xlu0 %v934_v4  ;;  %v348_v5 = vld [vmem:[%s311_s20 + $0x8] sm:$0xff]  ;;  %v347_v6 = vld [vmem:[%s311_s20] sm:$0xff]  ;;  %s344_s13 = scalar_select %p343_p12, %s920_s27, 1  ;;  %vm521_vm2 = vcmask 64512  }
  0x25   : > { %361 = vperm.xlu0 %876, %v353_v3   ;;  %877 = vset.pattern.permute.xlu1 %v934_v4  ;;  %v352_v7 = vld [vmem:[%s1118_s3] sm:$0xff]  ;;  %v351_v8 = vld [vmem:[%s1117_s2 + $0x8] sm:$0xff] }
  0x26   : > { %798 = vmatprep.subr.mxu0 %v348_v5  ;;  %v619_v9 = vld [vmem:[%s1121_s6] sm:$0xff]  ;;  %805 = vmatprep.subr.mxu1 %v935_v10  ;;  %s777_s14 = sshll.u32 %s344_s13, 3  ;;  %v604_v20 = vld [vmem:[%s1120_s5 + $0x8] sm:$0xff] }
  0x27   : > { %799 = vmatpush3.msra.mxu0 %v348_v5  ;;  %809 = vmatprep.mubr.msk.f32.mxu1 %vm936_vm1, %v935_v10  ;;  %s346_s18 = scalar_lea.vmem %s1116_s1, %s777_s14  ;;  %v519_v18 = vld [vmem:[%s1119_s4] sm:$0xff]  ;;  %v620_v21 = vld [vmem:[%s1121_s6 + $0x8] sm:$0xff] }
  0x28   : > { %800 = vmatprep.subr.mxu0 %v347_v6  ;;  %v349_v17 = vld [vmem:[%s346_s18] sm:$0xff]  ;;  %v520_v23 = vld [vmem:[%s1119_s4 + $0x8] sm:$0xff]  ;;  %s784_s18 = sshll.u32 (%p1025_p6), %s920_s27, 2 }
  0x29   : > { %356 = vperm.xlu0 %876, %v352_v7   ;;  %801 = vmatpush3.msra.mxu0 %v347_v6  ;;  %v603_v19 = vld [vmem:[%s1120_s5] sm:$0xff]  ;;  %s643_s20 = sadd.s32 (%p1025_p6), %s916_s26, %s784_s18 }
  0x2a   : > { %803 = vmatmul.mubr.msk.f32.vlgmr.msra.gmra.mxu0 %vm364_vm0, %v351_v8  ;;  %607 = vperm.xlu1 %877, %v603_v19   ;;  %s785_s24 = sshll.u32 (%p1025_p6), %s643_s20, 3 }
  0x2b   : > { %814 = vmatprep.mubr.msk.f32.mxu0 %vm521_vm2, %v519_v18  ;;  %s645_s23 = scalar_lea.vmem (%p1025_p6), %s1122_s7, %s785_s24 }
  0x2d   : > { %623 = vperm.xlu0 %876, %v619_v9  }
  0x2e   : > { %612 = vperm.xlu1 %877, %v604_v20  }
  0x32   : > { %628 = vperm.xlu1 %877, %v620_v21  }
  0xa0   : > { %v362_v11 = vpop.permute.xlu0 %361 }
  0xa4   : > { %v357_v14 = vpop.permute.xlu0 %356 }
  0xa5   : > { %v608_v25 = vpop.permute.xlu1 %607 }
  0xa8   : > { %v624_v35 = vpop.permute.xlu0 %623 }
  0xa9   : > { %v613_v26 = vpop.permute.xlu1 %612 }
  0xad   : > { %v629_v32 = vpop.permute.xlu1 %628 }
  0xea   : > { %v804_v12 = vpop.f32.mrf.mxu0 }
  0xeb   : > { %v443_v13 = vadd.f32 %v804_v12, %v362_v11 }
  0xec   : > { %v437_v15 = vpop.f32.mrf.mxu0 }
  0xed   : > { %v438_v16 = vadd.f32 %v437_v15, %v357_v14  ;;  %806 = vmatpush3.msra.mxu1 %v443_v13 }
  0xee   : > { %807 = vmatprep.subr.mxu1 %v935_v10 }
  0xef   : > { %808 = vmatpush3.msra.mxu1 %v438_v16 }
  0xf0   : > { %810 = vmatmul.mubr.msk.f32.vlgmr.msra.gmra.mxu1 %vm364_vm0, %v349_v17 }
 0x1b0   : > { %v515_v22 = vpop.f32.mrf.mxu1 }
 0x1b1   : > { %812 = vmatprep.subr.mxu0 %v515_v22 }
 0x1b2   : > { %v811_v24 = vpop.f32.mrf.mxu1  ;;  %813 = vmatpush3.msra.mxu0 %v515_v22 }
 0x1b3   : > { %815 = vmatmul.mubr.msk.f32.vlgmr.msra.gmra.mxu0 %vm521_vm2, %v520_v23 }
 0x273   : > { %v816_v27 = vpop.f32.mrf.mxu0 }
 0x274   : > { %v616_v28 = vmul.f32 %v816_v27, %v613_v26 }
 0x275   : > { %v594_v29 = vpop.f32.mrf.mxu0 }
 0x276   : > { %v618_v30 = vadd.f32 %v616_v28, %v348_v5  ;;  %v615_v31 = vmul.f32 %v608_v25, %v594_v29 }
 0x278   : > { %v632_v33 = vadd.f32 %v629_v32, %v618_v30  ;;  %v617_v34 = vadd.f32 %v615_v31, %v347_v6  ;;  %641 = sbr.rel (!%p1025_p6) target bundleno = 645 (0x285), region = 90 }
 0x27a   : > { %634 = vst [vmem:[%s342_s17 + $0x8] sm:$0xff] %v632_v33  ;;  %v631_v36 = vadd.f32 %v624_v35, %v617_v34 }
 0x27c   : > { %633 = vst [vmem:[%s342_s17] sm:$0xff] %v631_v36 }
 0x281   : > { %v678_v38 = vld [vmem:[%s342_s17 + $0x8] sm:$0xff] }
 0x282   : > { %679 = vst [vmem:[%s645_s23 + $0x10] sm:$0xff] %v678_v38 }
 0x283   : > { %v676_v37 = vld [vmem:[%s342_s17] sm:$0xff] }
 0x284   : > { %677 = vst [vmem:[%s645_s23] sm:$0xff] %v676_v37 }
 0x285 PF: > { %s17_s30 = sadd.s32 1, %s932_s30   ;;  %s1124_s24 = smov %s912_s25 }
 0x286   : > { %p14_p13 = scmp.ge.s32.totalorder %s17_s30, 6   ;;  %s1125_s25 = smov %s1033_s16 }
 0x287   : > { %s1126_s26 = smov %s924_s28  ;;  %s1127_s27 = smov %s928_s29 }
 0x288   : > { %s1128_s28 = smov %s1131_s8  ;;  %s1129_s29 = smov %s1135_s9 }
 0x289   :  { %16 = sbr.rel (!%p14_p13) target bundleno = 4 (0x4), region = 162 }

</bundles_post_ra>
